<compile_context>
chip_gen: v7x
topology: tpu7x:2x2x1
jax: 0.10.0
libtpu: 0.0.40
codegen_flags: <defaults>
</compile_context>

<pallas_src>
import functools

import jax
import jax.numpy as jnp
import numpy as np
from jax.experimental import pallas as pl
from jax.experimental.pallas import tpu as pltpu

CLAS = 100     # number of classes (CIFAR-100)
GAMMA = 1.5    # FocalLoss default


def _focal_loss_kernel(logits_ref, y_ref, loss_ref, *, gamma):
    logits = logits_ref[...].astype(jnp.float32)      # (TB, C), f32 math in-kernel
    y = y_ref[...]                                    # (TB, 1) int32 labels
    tb, c = logits.shape

    col = jax.lax.broadcasted_iota(jnp.int32, (tb, c), 1)

    # ---- log_softmax at the true class (division-free) ---------------------
    m = jnp.max(logits, axis=1, keepdims=True)                    # (TB, 1)
    shifted = logits - m                                          # (TB, C)
    denom = jnp.sum(jnp.exp(shifted), axis=1, keepdims=True)      # (TB, 1)
    shifted_true = jnp.sum(jnp.where(col == y, shifted, 0.0),
                           axis=1, keepdims=True)                 # (TB, 1)
    log_p = shifted_true - jnp.log(denom)                         # log(probs)
    p = jnp.exp(log_p)                                            # probs

    # ---- focal factor (1 - p)^gamma ----------------------------------------
    x = jnp.maximum(1.0 - p, 0.0)
    if gamma == 1.5:
        focal = x * jnp.sqrt(x)          # (1-p)^1.5 via EUP sqrt + one VPU mul
    elif gamma == 2.0:
        focal = x * x
    elif gamma == 1.0:
        focal = x
    else:
        focal = jnp.power(x, jnp.float32(gamma))

    loss_ref[...] = (-focal * log_p).astype(loss_ref.dtype)


def focal_loss(inputs, targets, gamma=GAMMA, block_b=512):
    """Per-sample focal loss, shape (N, 1) float32 — matches FocalLoss.forward."""
    b, c = inputs.shape
    y2 = targets.reshape(b, 1).astype(jnp.int32)

    # Batch tile: full batch when small, else a sublane-aligned (mult. of 8) block.
    tb = b if b <= block_b else block_b
    grid = (pl.cdiv(b, tb),)

    return pl.pallas_call(
        functools.partial(_focal_loss_kernel, gamma=gamma),
        out_shape=jax.ShapeDtypeStruct((b, 1), jnp.float32),
        grid_spec=pltpu.PrefetchScalarGridSpec(
            num_scalar_prefetch=0,
            grid=grid,
            in_specs=[pl.BlockSpec((tb, c), lambda i: (i, 0)),
                      pl.BlockSpec((tb, 1), lambda i: (i, 0))],
            out_specs=pl.BlockSpec((tb, 1), lambda i: (i, 0)),
        ),
        compiler_params=pltpu.CompilerParams(
            dimension_semantics=("parallel",)),
    )(inputs, y2)   # NOTE: native dtype passed through; cast happens in-kernel


def _reference(inputs, targets, gamma=GAMMA):
    """Pure-JAX reference mirroring the PyTorch forward."""
    p = jax.nn.softmax(inputs.astype(jnp.float32), axis=1)
    probs = jnp.take_along_axis(p, targets[:, None].astype(jnp.int32), axis=1)
    log_p = jnp.log(probs)
    return -jnp.power(1.0 - probs, gamma) * log_p


if __name__ == "__main__":
    key = jax.random.PRNGKey(0)
    k1, k2 = jax.random.split(key)
    B, C = 8, CLAS
    logits = jax.random.normal(k1, (B, C), dtype=jnp.float32) * 3.0
    targets = jax.random.randint(k2, (B,), 0, C, dtype=jnp.int32)

    # f32 logits path
    out = jax.block_until_ready(focal_loss(logits, targets))
    ref = _reference(logits, targets)
    np.testing.assert_allclose(np.asarray(out), np.asarray(ref),
                               rtol=1e-5, atol=1e-5)

    # bf16 logits path (no wrapper-side cast; kernel casts to f32 internally)
    out_bf16 = jax.block_until_ready(focal_loss(logits.astype(jnp.bfloat16), targets))
    ref_bf16 = _reference(logits.astype(jnp.bfloat16), targets)
    np.testing.assert_allclose(np.asarray(out_bf16), np.asarray(ref_bf16),
                               rtol=1e-4, atol=1e-4)

    print("KERNEL_OK")
</pallas_src>

<mosaic_0001>
module attributes {stable_mosaic.version = 11 : i64} {
  func.func @_focal_loss_kernel(%arg0: i32, %arg1: memref<8x100xf32, #tpu.memory_space<vmem>>, %arg2: memref<8x1xi32, #tpu.memory_space<vmem>>, %arg3: memref<8x1xf32, #tpu.memory_space<vmem>>) attributes {dimension_semantics = [#tpu.dimension_semantics<parallel>], iteration_bounds = array<i64: 1>, scalar_prefetch = 0 : i64, scratch_operands = 0 : i64, tpu.core_type = #tpu.core_type<tc>, window_params = [{transform_indices = @transform_0, window_bounds = array<i64: 8, 100>}, {transform_indices = @transform_1, window_bounds = array<i64: 8, 1>}, {transform_indices = @transform_2, window_bounds = array<i64: 8, 1>}]} {
    %c0 = arith.constant 0 : index
    %c0_0 = arith.constant 0 : index
    %0 = vector.load %arg1[%c0, %c0_0] : memref<8x100xf32, #tpu.memory_space<vmem>>, vector<8x100xf32>
    %c0_1 = arith.constant 0 : index
    %c0_2 = arith.constant 0 : index
    %1 = vector.load %arg2[%c0_1, %c0_2] : memref<8x1xi32, #tpu.memory_space<vmem>>, vector<8x1xi32>
    %2 = tpu.iota {dimensions = array<i32: 1>} : vector<8x100xi32>
    %cst = arith.constant dense<0xFF800000> : vector<8xf32>
    %3 = vector.multi_reduction <maximumf>, %0, %cst [1] : vector<8x100xf32> to vector<8xf32>
    %4 = vector.shape_cast %3 : vector<8xf32> to vector<8x1xf32>
    %5 = vector.broadcast %4 : vector<8x1xf32> to vector<8x100xf32>
    %6 = arith.subf %0, %5 : vector<8x100xf32>
    %7 = math.exp %6 : vector<8x100xf32>
    %cst_3 = arith.constant dense<0.000000e+00> : vector<8xf32>
    %8 = vector.multi_reduction <add>, %7, %cst_3 [1] : vector<8x100xf32> to vector<8xf32>
    %9 = vector.shape_cast %8 : vector<8xf32> to vector<8x1xf32>
    %10 = vector.broadcast %1 : vector<8x1xi32> to vector<8x100xi32>
    %11 = arith.cmpi eq, %2, %10 : vector<8x100xi32>
    %cst_4 = arith.constant 0.000000e+00 : f32
    %12 = vector.broadcast %cst_4 : f32 to vector<8x100xf32>
    %13 = arith.select %11, %6, %12 : vector<8x100xi1>, vector<8x100xf32>
    %cst_5 = arith.constant dense<0.000000e+00> : vector<8xf32>
    %14 = vector.multi_reduction <add>, %13, %cst_5 [1] : vector<8x100xf32> to vector<8xf32>
    %15 = vector.shape_cast %14 : vector<8xf32> to vector<8x1xf32>
    %16 = math.log %9 : vector<8x1xf32>
    %17 = arith.subf %15, %16 : vector<8x1xf32>
    %18 = math.exp %17 : vector<8x1xf32>
    %cst_6 = arith.constant 1.000000e+00 : f32
    %19 = vector.broadcast %cst_6 : f32 to vector<8x1xf32>
    %20 = arith.subf %19, %18 : vector<8x1xf32>
    %cst_7 = arith.constant 0.000000e+00 : f32
    %21 = vector.broadcast %cst_7 : f32 to vector<8x1xf32>
    %22 = arith.maximumf %20, %21 : vector<8x1xf32>
    %23 = math.sqrt %22 : vector<8x1xf32>
    %24 = arith.mulf %22, %23 : vector<8x1xf32>
    %cst_8 = arith.constant 0.000000e+00 : f32
    %25 = vector.broadcast %cst_8 : f32 to vector<8x1xf32>
    %26 = arith.subf %25, %24 : vector<8x1xf32>
    %27 = arith.mulf %26, %17 : vector<8x1xf32>
    %c0_9 = arith.constant 0 : index
    %c0_10 = arith.constant 0 : index
    %28 = vector.load %arg3[%c0_9, %c0_10] : memref<8x1xf32, #tpu.memory_space<vmem>>, vector<8x1xf32>
    tpu.vector_store %arg3[%c0_9, %c0_10], %27 {strides = array<i32>} : memref<8x1xf32, #tpu.memory_space<vmem>>, vector<8x1xf32>,
    return
  }
  func.func @transform_0(%arg0: i32) -> (i32, i32) {
    %c0_i32 = arith.constant 0 : i32
    %c0_i32_0 = arith.constant 0 : i32
    return %arg0, %c0_i32 : i32, i32
  }
  func.func @transform_1(%arg0: i32) -> (i32, i32) {
    %c0_i32 = arith.constant 0 : i32
    %c0_i32_0 = arith.constant 0 : i32
    return %arg0, %c0_i32 : i32, i32
  }
  func.func @transform_2(%arg0: i32) -> (i32, i32) {
    %c0_i32 = arith.constant 0 : i32
    %c0_i32_0 = arith.constant 0 : i32
    return %arg0, %c0_i32 : i32, i32
  }
}

</mosaic_0001>

<bundles_post_ra>
// kernel: tpu_custom_call.1
= control target key start
LH: loop header
LB: loop body
LE: loop exit
PB: predicated region body
PF: predicated region fallthrough
CT: control target
= control target key end

     0   :  { %vm15_vm0 = vcmask 818176   ;;  %v66_v1 = vmov 0   ;;  %v13_v7 = vlaneseq  ;;  %vm50_vm4 = vcmask 7168   ;;  %s94_s0 = inlined_call_operand.vmem [shape: f32[8,100], index: 0, kind: input, shape index: {}]   ;;  %s95_s1 = inlined_call_operand.vmem [shape: s32[8,1], index: 1, kind: input, shape index: {}]   ;;  %s96_s2 = inlined_call_operand.vmem [shape: f32[8,1], index: 2, kind: output, shape index: {}]  }
   0x1   :  { %v11_v0 = vld [vmem:[%s94_s0] sm:$0xff]  ;;  %57 = vset.pattern.permute.xlu0 %v66_v1 }
   0x2   :  { %v16_v2 = vsel %vm15_vm0, %v11_v0, -inf  ;;  %v12_v3 = vld [vmem:[%s95_s1] sm:$0xff]  ;;  %v14_v8 = vand.u32 127, %v13_v7 }
   0x3   :  { %17 = vmax.xlane.f32.xlu0 %v16_v2 }
  0x19   :  { %26 = vperm.xlu0 %57, %v12_v3  }
  0x90   :  { %v18_v4 = vpop.xlane.xlu0 %17 }
  0x91   :  { %v19_v5 = vsub.f32 %v11_v0, %v18_v4 }
  0x93   :  { %v20_v6 = vmul.f32 1.442695, %v19_v5 }
  0x95   :  { %58 = vpow2.f32 %v20_v6 }
  0x98   :  { %v27_v9 = vpop.permute.xlu0 %26 }
  0x99   :  { %vm28_vm1 = vcmp.eq.s32.totalorder %v14_v8, %v27_v9 }
  0x9a   :  { %v29_v12 = vsel %vm28_vm1, %v19_v5, 0.0 }
  0x9b   :  { %v30_v13 = vsel %vm15_vm0, %v29_v12, 0.0 }
  0x9f   :  { %v59_v10 = vpop.eup %58 }
  0xa0   :  { %v22_v11 = vsel %vm15_vm0, %v59_v10, 0.0 }
  0xa1   :  { %23 = vadd.xlane.f32.xlu1 %v22_v11 }
  0xa5   :  { %31 = vadd.xlane.f32.xlu1 %v30_v13 }
 0x12e   :  { %v24_v14 = vpop.xlane.xlu1 %23 }
 0x12f   :  { %60 = vlog2.f32 %v24_v14 }
 0x132   :  { %v32_v17 = vpop.xlane.xlu1 %31 }
 0x139   :  { %v61_v15 = vpop.eup %60 }
 0x13a   :  { %v34_v16 = vmul.f32 0.6931472, %v61_v15 }
 0x13c   :  { %v35_v18 = vsub.f32 %v32_v17, %v34_v16 }
 0x13e   :  { %v36_v19 = vmul.f32 1.442695, %v35_v18 }
 0x140   :  { %62 = vpow2.f32 %v36_v19 }
 0x14a   :  { %v63_v20 = vpop.eup %62 }
 0x14b   :  { %v38_v21 = vsub.f32 1.0, %v63_v20 }
 0x14d   :  { %v39_v22 = vmax.f32 %v38_v21, 0.0 }
 0x14f   :  { %64 = vrsqrt.f32 %v39_v22  ;;  %vm42_vm2 = vcmp.eq.f32.partialorder %v39_v22, inf  ;;  %v45_v25 = vand.u32 2147483648, %v39_v22  ;;  %vm44_vm3 = vcmp.eq.f32.partialorder %v39_v22, 0.0 }
 0x159   :  { %v65_v23 = vpop.eup %64 }
 0x15a   :  { %v41_v24 = vmul.f32 %v65_v23, %v39_v22 }
 0x15c   :  { %v43_v26 = vsel %vm42_vm2, %v39_v22, %v41_v24 }
 0x15d   :  { %v46_v27 = vsel %vm44_vm3, %v45_v25, %v43_v26 }
 0x15e   :  { %v47_v28 = vmul.f32 %v46_v27, %v39_v22 }
 0x160   :  { %v48_v29 = vsub.f32 0.0, %v47_v28 }
 0x162   :  { %v49_v30 = vmul.f32 %v48_v29, %v35_v18 }
 0x164   :  { %51 = vst.msk [vmem:[%s96_s2] sm:$0xff] %vm50_vm4, %v49_v30 }

</bundles_post_ra>
